<compile_context>
chip_gen: v5e
topology: v5e:2x2
jax: 0.10.0
libtpu: 0.0.40
codegen_flags: <defaults>
</compile_context>

<pallas_src>
import jax
import jax.numpy as jnp
import numpy as np
from jax.experimental import pallas as pl
from jax.experimental.pallas import tpu as pltpu


# ---------------------------------------------------------------------------
# Kernels
# ---------------------------------------------------------------------------
def _node_encoder_kernel(idx_ref, x2_ref, emb_ref, wg_ref, bg_ref,
                         wn1_ref, wn2_ref, bn_ref, out_ref):
    f32 = jnp.float32
    cdt = wg_ref.dtype                                    # compute dtype (f32 or bf16)

    # Embedding lookup as one_hot @ ReLU(table); ReLU is pre-applied in the wrapper,
    # the matmul is exact since each row selects exactly one table row.
    idx = idx_ref[...]                                    # (T, 1) int32
    t = idx.shape[0]
    cats = emb_ref.shape[0]
    iota = jax.lax.broadcasted_iota(jnp.int32, (t, cats), 1)
    one_hot = (iota == idx).astype(cdt)                   # (T, cats)
    x1_emb = jnp.dot(one_hot, emb_ref[...], preferred_element_type=cdt)

    # geom_encoder: Linear + ReLU (f32 accumulation + f32 epilogue).
    x2_enc = jnp.maximum(
        jnp.dot(x2_ref[...].astype(cdt), wg_ref[...],
                preferred_element_type=f32) + bg_ref[...], 0.0)

    # node_encoder on cat([x2_enc, x1_emb], -1), concat-free weight split:
    #   cat @ Wn == x2_enc @ Wn[:node_dim] + x1_emb @ Wn[node_dim:]
    h = (jnp.dot(x2_enc.astype(cdt), wn1_ref[...], preferred_element_type=f32)
         + jnp.dot(x1_emb, wn2_ref[...], preferred_element_type=f32)
         + bn_ref[...])
    out_ref[...] = jnp.maximum(h, 0.0).astype(out_ref.dtype)


def _edge_encoder_kernel(e_ref, we_ref, be_ref, out_ref):
    cdt = we_ref.dtype
    h = jnp.dot(e_ref[...].astype(cdt), we_ref[...],
                preferred_element_type=jnp.float32) + be_ref[...]
    out_ref[...] = jnp.maximum(h, 0.0).astype(out_ref.dtype)


# ---------------------------------------------------------------------------
# Helpers
# ---------------------------------------------------------------------------
def _round_up(x, m):
    return (x + m - 1) // m * m


def _pick_tile_rows(n_rows, per_row_bytes, *, budget_bytes=8 << 20,
                    min_tile=512, max_tile=8192):
    """Largest row tile whose double-buffered streaming footprint fits the budget."""
    t = budget_bytes // max(int(per_row_bytes), 1)
    t = max(min_tile, min(max_tile, t))
    t = min(t, _round_up(n_rows, 16))
    # Keep >=2 grid steps when there is enough work so the "parallel" row axis can be
    # sharded across both TensorCores on v7x.
    if n_rows >= 2 * min_tile and t >= n_rows:
        t = pl.cdiv(n_rows, 2)
    return max(16, _round_up(int(t), 16))


# ---------------------------------------------------------------------------
# Wrapper
# ---------------------------------------------------------------------------
def graph_encoder_forward(x1, x2, edge_feat, params, *, tile_rows=None,
                          use_bf16=True, out_dtype=None):
    """x1: (N,1) int ids; x2: (N, geom_dim) float; edge_feat: (E, inter_geom_dim) float."""
    emb, wg, bg = params["emb"], params["wg"], params["bg"]
    wn, bn = params["wn"], params["bn"]
    we, be = params["we"], params["be"]

    cats_dim, node_dim = emb.shape
    geom_dim = wg.shape[0]
    inter_geom_dim, edge_dim = we.shape

    cdt = jnp.bfloat16 if use_bf16 else jnp.float32
    odt = out_dtype if out_dtype is not None else cdt

    # Weights in compute dtype (cast once); biases stay f32 (f32 epilogue).
    # ReLU folded into the embedding table (exact through the one-hot matmul).
    emb_c = jnp.maximum(emb, 0.0).astype(cdt)
    wg_c = wg.astype(cdt)
    wn1_c = wn[:node_dim].astype(cdt)      # multiplies x2_enc (concat order [x2_enc, x1_emb])
    wn2_c = wn[node_dim:].astype(cdt)      # multiplies x1_emb
    we_c = we.astype(cdt)
    bg_f = bg.astype(jnp.float32)
    bn_f = bn.astype(jnp.float32)
    be_f = be.astype(jnp.float32)

    x1_i = x1.astype(jnp.int32)
    n = x1.shape[0]
    e = edge_feat.shape[0]
    out_b = jnp.dtype(odt).itemsize
    cdt_b = jnp.dtype(cdt).itemsize
    x2_b = x2.dtype.itemsize
    ef_b = edge_feat.dtype.itemsize

    const = lambda shape: pl.BlockSpec(shape, lambda i: (0, 0))

    # ------------------------- node encoder -------------------------
    node_row_bytes = 2 * (4 + geom_dim * x2_b + node_dim * out_b)   # double-buffered stream
    tn = tile_rows if tile_rows is not None else _pick_tile_rows(n, node_row_bytes)
    tn = max(16, _round_up(min(int(tn), _round_up(n, 16)), 16))

    node_cost = pl.CostEstimate(
        flops=2 * n * node_dim * (cats_dim + geom_dim + 2 * node_dim),
        transcendentals=0,
        bytes_accessed=(n * (4 + geom_dim * x2_b + node_dim * out_b)
                        + (emb_c.size + wg_c.size + wn1_c.size + wn2_c.size) * cdt_b
                        + (bg_f.size + bn_f.size) * 4))

    node_encod = pl.pallas_call(
        _node_encoder_kernel,
        grid=(pl.cdiv(n, tn),),
        in_specs=[
            pl.BlockSpec((tn, 1), lambda i: (i, 0)),            # x1 ids (row tiled)
            pl.BlockSpec((tn, geom_dim), lambda i: (i, 0)),     # x2     (row tiled)
            const(emb_c.shape),                                 # VMEM-resident table
            const(wg_c.shape), const(bg_f.shape),
            const(wn1_c.shape), const(wn2_c.shape), const(bn_f.shape),
        ],
        out_specs=pl.BlockSpec((tn, node_dim), lambda i: (i, 0)),
        out_shape=jax.ShapeDtypeStruct((n, node_dim), odt),     # true width, no slicing
        compiler_params=pltpu.CompilerParams(dimension_semantics=("parallel",)),
        cost_estimate=node_cost,
    )(x1_i, x2, emb_c, wg_c, bg_f, wn1_c, wn2_c, bn_f)

    # ------------------------- edge encoder -------------------------
    edge_row_bytes = 2 * (inter_geom_dim * ef_b + edge_dim * out_b)
    te = tile_rows if tile_rows is not None else _pick_tile_rows(e, edge_row_bytes)
    te = max(16, _round_up(min(int(te), _round_up(e, 16)), 16))

    edge_cost = pl.CostEstimate(
        flops=2 * e * inter_geom_dim * edge_dim,
        transcendentals=0,
        bytes_accessed=(e * (inter_geom_dim * ef_b + edge_dim * out_b)
                        + we_c.size * cdt_b + be_f.size * 4))

    edge_encod = pl.pallas_call(
        _edge_encoder_kernel,
        grid=(pl.cdiv(e, te),),
        in_specs=[
            pl.BlockSpec((te, inter_geom_dim), lambda i: (i, 0)),
            const(we_c.shape), const(be_f.shape),
        ],
        out_specs=pl.BlockSpec((te, edge_dim), lambda i: (i, 0)),
        out_shape=jax.ShapeDtypeStruct((e, edge_dim), odt),
        compiler_params=pltpu.CompilerParams(dimension_semantics=("parallel",)),
        cost_estimate=edge_cost,
    )(edge_feat, we_c, be_f)

    return node_encod, edge_encod


# ---------------------------------------------------------------------------
# Deterministic parameter init (mirrors the PyTorch module's __init__)
# ---------------------------------------------------------------------------
def _xavier_uniform(key, fan_in, fan_out, gain=1.0):
    bound = gain * np.sqrt(6.0 / (fan_in + fan_out))
    return jax.random.uniform(key, (fan_in, fan_out), jnp.float32, -bound, bound)


def make_params(cats_dim, geom_dim, node_dim, inter_geom_dim, edge_dim, seed=0):
    keys = jax.random.split(jax.random.PRNGKey(seed), 4)
    return {
        # nn.Embedding default init ~ N(0, 1)
        "emb": jax.random.normal(keys[0], (cats_dim, node_dim), jnp.float32),
        # geom_encoder Linear: xavier_uniform weight, bias = 0.01
        "wg": _xavier_uniform(keys[1], geom_dim, node_dim),
        "bg": jnp.full((1, node_dim), 0.01, jnp.float32),
        # node_encoder Linear
        "wn": _xavier_uniform(keys[2], 2 * node_dim, node_dim),
        "bn": jnp.full((1, node_dim), 0.01, jnp.float32),
        # edge_encoder Linear (edge_type != 'door')
        "we": _xavier_uniform(keys[3], inter_geom_dim, edge_dim),
        "be": jnp.full((1, edge_dim), 0.01, jnp.float32),
    }


# ---------------------------------------------------------------------------
# Pure-JAX f32 reference (matches the torch module in eval mode)
# ---------------------------------------------------------------------------
def _reference(x1, x2, edge_feat, params):
    x1_emb = jnp.maximum(params["emb"][x1[:, 0]], 0.0)
    x2_enc = jnp.maximum(x2 @ params["wg"] + params["bg"], 0.0)
    node_in = jnp.concatenate([x2_enc, x1_emb], axis=-1)
    node = jnp.maximum(node_in @ params["wn"] + params["bn"], 0.0)
    edge = jnp.maximum(edge_feat @ params["we"] + params["be"], 0.0)
    return node, edge


if __name__ == "__main__":
    # Small config consistent with the module's forward. N/E deliberately NOT multiples
    # of the tile so the last-block over-run (masked writeback) path is exercised.
    cats_dim, geom_dim, node_dim = 16, 8, 32
    inter_geom_dim, edge_dim = 8, 32
    N, E = 250, 390

    key = jax.random.PRNGKey(0)
    k1, k2, k3 = jax.random.split(key, 3)
    x1 = jax.random.randint(k1, (N, 1), 0, cats_dim, dtype=jnp.int32)      # category ids
    x2 = jax.random.normal(k2, (N, geom_dim), jnp.float32)                 # geometry feats
    edge_feat = jax.random.normal(k3, (E, inter_geom_dim), jnp.float32)    # edge feats

    params = make_params(cats_dim, geom_dim, node_dim, inter_geom_dim, edge_dim)
    ref_node, ref_edge = _reference(x1, x2, edge_feat, params)

    # --- f32 path, small explicit tile -> multi-step grid + uneven last block ---
    node_f32, edge_f32 = graph_encoder_forward(
        x1, x2, edge_feat, params, tile_rows=128, use_bf16=False)
    jax.block_until_ready((node_f32, edge_f32))
    assert node_f32.shape == (N, node_dim) and edge_f32.shape == (E, edge_dim)
    np.testing.assert_allclose(np.asarray(node_f32), np.asarray(ref_node),
                               rtol=1e-5, atol=2e-5)
    np.testing.assert_allclose(np.asarray(edge_f32), np.asarray(ref_edge),
                               rtol=1e-5, atol=2e-5)

    # --- default path: bf16 compute + bf16 outputs, auto tile -------------------
    node_bf, edge_bf = graph_encoder_forward(x1, x2, edge_feat, params)
    jax.block_until_ready((node_bf, edge_bf))
    assert node_bf.shape == (N, node_dim) and edge_bf.shape == (E, edge_dim)
    np.testing.assert_allclose(np.asarray(node_bf.astype(jnp.float32)),
                               np.asarray(ref_node), rtol=5e-2, atol=5e-2)
    np.testing.assert_allclose(np.asarray(edge_bf.astype(jnp.float32)),
                               np.asarray(ref_edge), rtol=5e-2, atol=5e-2)

    print("KERNEL_OK")
</pallas_src>

<mosaic_0001>
module attributes {stable_mosaic.version = 11 : i64} {
  func.func @_node_encoder_kernel(%arg0: i32, %arg1: memref<128x1xi32, #tpu.memory_space<vmem>>, %arg2: memref<128x8xf32, #tpu.memory_space<vmem>>, %arg3: memref<16x32xf32, #tpu.memory_space<vmem>>, %arg4: memref<8x32xf32, #tpu.memory_space<vmem>>, %arg5: memref<1x32xf32, #tpu.memory_space<vmem>>, %arg6: memref<32x32xf32, #tpu.memory_space<vmem>>, %arg7: memref<32x32xf32, #tpu.memory_space<vmem>>, %arg8: memref<1x32xf32, #tpu.memory_space<vmem>>, %arg9: memref<128x32xf32, #tpu.memory_space<vmem>>) attributes {dimension_semantics = [#tpu.dimension_semantics<parallel>], iteration_bounds = array<i64: 2>, scalar_prefetch = 0 : i64, scratch_operands = 0 : i64, tpu.core_type = #tpu.core_type<tc>, window_params = [{transform_indices = @transform_0, window_bounds = array<i64: 128, 1>}, {transform_indices = @transform_1, window_bounds = array<i64: 128, 8>}, {pipeline_mode = #tpu.pipeline_mode<synchronous>, transform_indices = @transform_2, window_bounds = array<i64: 16, 32>}, {pipeline_mode = #tpu.pipeline_mode<synchronous>, transform_indices = @transform_3, window_bounds = array<i64: 8, 32>}, {pipeline_mode = #tpu.pipeline_mode<synchronous>, transform_indices = @transform_4, window_bounds = array<i64: 1, 32>}, {pipeline_mode = #tpu.pipeline_mode<synchronous>, transform_indices = @transform_5, window_bounds = array<i64: 32, 32>}, {pipeline_mode = #tpu.pipeline_mode<synchronous>, transform_indices = @transform_6, window_bounds = array<i64: 32, 32>}, {pipeline_mode = #tpu.pipeline_mode<synchronous>, transform_indices = @transform_7, window_bounds = array<i64: 1, 32>}, {transform_indices = @transform_8, window_bounds = array<i64: 128, 32>}]} {
    %c0 = arith.constant 0 : index
    %c0_0 = arith.constant 0 : index
    %0 = vector.load %arg1[%c0, %c0_0] : memref<128x1xi32, #tpu.memory_space<vmem>>, vector<128x1xi32>
    %1 = tpu.iota {dimensions = array<i32: 1>} : vector<128x16xi32>
    %2 = vector.broadcast %0 : vector<128x1xi32> to vector<128x16xi32>
    %3 = arith.cmpi eq, %1, %2 : vector<128x16xi32>
    %4 = arith.extui %3 : vector<128x16xi1> to vector<128x16xi32>
    %5 = arith.sitofp %4 : vector<128x16xi32> to vector<128x16xf32>
    %c0_1 = arith.constant 0 : index
    %c0_2 = arith.constant 0 : index
    %6 = vector.load %arg3[%c0_1, %c0_2] : memref<16x32xf32, #tpu.memory_space<vmem>>, vector<16x32xf32>
    %cst = arith.constant dense<0.000000e+00> : vector<128x32xf32>
    %7 = tpu.matmul %5, %6, %cst {dimension_numbers = #tpu.dot_dimension_numbers<[1], [0], [0], [1], [0, 0, 1, 1], [], []>} : vector<128x16xf32>, vector<16x32xf32>, vector<128x32xf32> -> vector<128x32xf32>
    %c0_3 = arith.constant 0 : index
    %c0_4 = arith.constant 0 : index
    %8 = vector.load %arg2[%c0_3, %c0_4] : memref<128x8xf32, #tpu.memory_space<vmem>>, vector<128x8xf32>
    %c0_5 = arith.constant 0 : index
    %c0_6 = arith.constant 0 : index
    %9 = vector.load %arg4[%c0_5, %c0_6] : memref<8x32xf32, #tpu.memory_space<vmem>>, vector<8x32xf32>
    %cst_7 = arith.constant dense<0.000000e+00> : vector<128x32xf32>
    %10 = tpu.matmul %8, %9, %cst_7 {dimension_numbers = #tpu.dot_dimension_numbers<[1], [0], [0], [1], [0, 0, 1, 1], [], []>} : vector<128x8xf32>, vector<8x32xf32>, vector<128x32xf32> -> vector<128x32xf32>
    %c0_8 = arith.constant 0 : index
    %c0_9 = arith.constant 0 : index
    %11 = vector.load %arg5[%c0_8, %c0_9] : memref<1x32xf32, #tpu.memory_space<vmem>>, vector<1x32xf32>
    %12 = vector.broadcast %11 : vector<1x32xf32> to vector<128x32xf32>
    %13 = arith.addf %10, %12 : vector<128x32xf32>
    %cst_10 = arith.constant 0.000000e+00 : f32
    %14 = vector.broadcast %cst_10 : f32 to vector<128x32xf32>
    %15 = arith.maximumf %13, %14 : vector<128x32xf32>
    %c0_11 = arith.constant 0 : index
    %c0_12 = arith.constant 0 : index
    %16 = vector.load %arg6[%c0_11, %c0_12] : memref<32x32xf32, #tpu.memory_space<vmem>>, vector<32x32xf32>
    %cst_13 = arith.constant dense<0.000000e+00> : vector<128x32xf32>
    %17 = tpu.matmul %15, %16, %cst_13 {dimension_numbers = #tpu.dot_dimension_numbers<[1], [0], [0], [1], [0, 0, 1, 1], [], []>} : vector<128x32xf32>, vector<32x32xf32>, vector<128x32xf32> -> vector<128x32xf32>
    %c0_14 = arith.constant 0 : index
    %c0_15 = arith.constant 0 : index
    %18 = vector.load %arg7[%c0_14, %c0_15] : memref<32x32xf32, #tpu.memory_space<vmem>>, vector<32x32xf32>
    %cst_16 = arith.constant dense<0.000000e+00> : vector<128x32xf32>
    %19 = tpu.matmul %7, %18, %cst_16 {dimension_numbers = #tpu.dot_dimension_numbers<[1], [0], [0], [1], [0, 0, 1, 1], [], []>} : vector<128x32xf32>, vector<32x32xf32>, vector<128x32xf32> -> vector<128x32xf32>
    %20 = arith.addf %17, %19 : vector<128x32xf32>
    %c0_17 = arith.constant 0 : index
    %c0_18 = arith.constant 0 : index
    %21 = vector.load %arg8[%c0_17, %c0_18] : memref<1x32xf32, #tpu.memory_space<vmem>>, vector<1x32xf32>
    %22 = vector.broadcast %21 : vector<1x32xf32> to vector<128x32xf32>
    %23 = arith.addf %20, %22 : vector<128x32xf32>
    %cst_19 = arith.constant 0.000000e+00 : f32
    %24 = vector.broadcast %cst_19 : f32 to vector<128x32xf32>
    %25 = arith.maximumf %23, %24 : vector<128x32xf32>
    %c0_20 = arith.constant 0 : index
    %c0_21 = arith.constant 0 : index
    %26 = vector.load %arg9[%c0_20, %c0_21] : memref<128x32xf32, #tpu.memory_space<vmem>>, vector<128x32xf32>
    tpu.vector_store %arg9[%c0_20, %c0_21], %25 {strides = array<i32>} : memref<128x32xf32, #tpu.memory_space<vmem>>, vector<128x32xf32>,
    return
  }
  func.func @transform_0(%arg0: i32) -> (i32, i32) {
    %c0_i32 = arith.constant 0 : i32
    %c0_i32_0 = arith.constant 0 : i32
    return %arg0, %c0_i32 : i32, i32
  }
  func.func @transform_1(%arg0: i32) -> (i32, i32) {
    %c0_i32 = arith.constant 0 : i32
    %c0_i32_0 = arith.constant 0 : i32
    return %arg0, %c0_i32 : i32, i32
  }
  func.func @transform_2(%arg0: i32) -> (i32, i32) {
    %c0_i32 = arith.constant 0 : i32
    %c0_i32_0 = arith.constant 0 : i32
    %c0_i32_1 = arith.constant 0 : i32
    return %c0_i32, %c0_i32_0 : i32, i32
  }
  func.func @transform_3(%arg0: i32) -> (i32, i32) {
    %c0_i32 = arith.constant 0 : i32
    %c0_i32_0 = arith.constant 0 : i32
    %c0_i32_1 = arith.constant 0 : i32
    return %c0_i32, %c0_i32_0 : i32, i32
  }
  func.func @transform_4(%arg0: i32) -> (i32, i32) {
    %c0_i32 = arith.constant 0 : i32
    %c0_i32_0 = arith.constant 0 : i32
    %c0_i32_1 = arith.constant 0 : i32
    return %c0_i32, %c0_i32_0 : i32, i32
  }
  func.func @transform_5(%arg0: i32) -> (i32, i32) {
    %c0_i32 = arith.constant 0 : i32
    %c0_i32_0 = arith.constant 0 : i32
    %c0_i32_1 = arith.constant 0 : i32
    return %c0_i32, %c0_i32_0 : i32, i32
  }
  func.func @transform_6(%arg0: i32) -> (i32, i32) {
    %c0_i32 = arith.constant 0 : i32
    %c0_i32_0 = arith.constant 0 : i32
    %c0_i32_1 = arith.constant 0 : i32
    return %c0_i32, %c0_i32_0 : i32, i32
  }
  func.func @transform_7(%arg0: i32) -> (i32, i32) {
    %c0_i32 = arith.constant 0 : i32
    %c0_i32_0 = arith.constant 0 : i32
    %c0_i32_1 = arith.constant 0 : i32
    return %c0_i32, %c0_i32_0 : i32, i32
  }
  func.func @transform_8(%arg0: i32) -> (i32, i32) {
    %c0_i32 = arith.constant 0 : i32
    %c0_i32_0 = arith.constant 0 : i32
    return %arg0, %c0_i32 : i32, i32
  }
}

</mosaic_0001>

<bundles_post_ra>
// kernel: tpu_custom_call.1
= control target key start
LH: loop header
LB: loop body
LE: loop exit
PB: predicated region body
PF: predicated region fallthrough
CT: control target
= control target key end

     0   :  { %s1230_s27 = smov 0   ;;  %s1510_s0 = inlined_call_operand.vmem [shape: s32[250,1], index: 0, kind: input, shape index: {}]   ;;  %s1511_s1 = inlined_call_operand.vmem [shape: f32[250,8], index: 1, kind: input, shape index: {}]   ;;  %s1512_s2 = inlined_call_operand.vmem [shape: f32[16,32], index: 2, kind: input, shape index: {}]   ;;  %s1513_s3 = inlined_call_operand.vmem [shape: f32[8,32], index: 3, kind: input, shape index: {}]   ;;  %s1514_s4 = inlined_call_operand.vmem [shape: f32[1,32], index: 4, kind: input, shape index: {}]   ;;  %s1515_s5 = inlined_call_operand.vmem [shape: f32[32,32], index: 5, kind: input, shape index: {}]   ;;  %s1516_s6 = inlined_call_operand.vmem [shape: f32[32,32], index: 6, kind: input, shape index: {}]   ;;  %s1517_s7 = inlined_call_operand.vmem [shape: f32[1,32], index: 7, kind: input, shape index: {}]   ;;  %s1518_s8 = inlined_call_operand.vmem [shape: f32[250,32], index: 8, kind: output, shape index: {}]  }
   0x1 LB: > { %s1067_s28 = sadd.s32 4294967295, %s1181_s27   ;;  %p1071_p0 = scmp.ge.s32.totalorder %s1181_s27, 1  ;;  %s1181_s27 = sphi %s1230_s27, %s18_s27  }
   0x2   : > { %p274_p1 = scmp.lt.s32.totalorder %s1181_s27, 3 }
   0x4   : > { %p275_p2 = pnand %p1071_p0, %p274_p1 }
   0x5   : > { %s1072_s29 = sshll.u32 (!%p275_p2), %s1067_s28, 4 }
   0x6   : > { %278 = sbr.rel (%p275_p2) target bundleno = 517 (0x205), region = 52  ;;  %p314_p3 = scmp.lt.s32.totalorder (!%p275_p2), %s1072_s29, 31 }
   0xb   : > { %v1183_v0 = vmov 0   ;;  %s1520_s29 = smov (!%p314_p3, %s1072_s29), 31  ;;  %v577_v7 = vld [vmem:[%s1513_s3] sm:$0xff]  ;;  %vm582_vm0 = vcmask 64512   ;;  %v446_v9 = vld [vmem:[%s1512_s2 + $0x8] sm:$0xff]  ;;  %v347_v26 = vlaneseq  ;;  %v1184_v30 = vmov 0.0  }
   0xc   : > { %1171 = vset.pattern.permute.xlu1 %v1183_v0  ;;  %1170 = vset.pattern.permute.xlu0 %v1183_v0  ;;  %s1238_s30 = sshll.u32 %s1520_s29, 3  ;;  %v445_v20 = vld [vmem:[%s1512_s2] sm:$0xff]  ;;  %vm447_vm2 = vcmask 130048  }
   0xd   : > { %1172 = vset.pattern.permute.xlu2 %v1183_v0  ;;  %s1244_s11 = scalar_lea.vmem %s1510_s0, %s1238_s30  ;;  %s1255_s14 = scalar_lea.vmem %s1511_s1, %s1238_s30  ;;  %646 = vmatpush.msra.mxu1 %v577_v7  ;;  %v1287_v27 = vand.u32 127, %v347_v26  ;;  %v719_v7 = vld [vmem:[%s1516_s6 + $0x18] sm:$0xff] }
   0xe   : > { %v333_v1 = vld [vmem:[%s1244_s11 + $0x10] sm:$0xff]  ;;  %v331_v2 = vld [vmem:[%s1244_s11] sm:$0xff]  ;;  %v334_v4 = vld [vmem:[%s1244_s11 + $0x18] sm:$0xff]  ;;  %510 = vmatpush.msra.mxu0 %v446_v9  ;;  %781 = vmatpush.msra.mxu2 %v719_v7  ;;  %s1458_s23 = scalar_lea.vmem %s1518_s8, %s1238_s30 }
   0xf   : > { %356 = vperm.xlu1 %1171, %v333_v1   ;;  %350 = vperm.xlu0 %1170, %v331_v2   ;;  %v335_v3 = vld [vmem:[%s1244_s11 + $0x20] sm:$0xff]  ;;  %v332_v5 = vld [vmem:[%s1244_s11 + $0x8] sm:$0xff]  ;;  %v338_v10 = vld [vmem:[%s1244_s11 + $0x38] sm:$0xff] }
  0x10   : > { %362 = vperm.xlu2 %1172, %v335_v3   ;;  %v336_v6 = vld [vmem:[%s1244_s11 + $0x28] sm:$0xff]  ;;  %v561_v8 = vld [vmem:[%s1255_s14] sm:$0xff]  ;;  %v337_v11 = vld [vmem:[%s1244_s11 + $0x30] sm:$0xff]  ;;  %511 = vmatpush.msra.mxu0 %v445_v20 }
  0x11   : > { %1110 = vmatmul.msk.f32.vlgmr.msra.gmra.mxu1 %vm582_vm0, %v561_v8  ;;  %v339_v12 = vld [vmem:[%s1244_s11 + $0x40] sm:$0xff]  ;;  %v341_v13 = vld [vmem:[%s1244_s11 + $0x50] sm:$0xff]  ;;  %v340_v14 = vld [vmem:[%s1244_s11 + $0x48] sm:$0xff] }
  0x12   : > { %v342_v15 = vld [vmem:[%s1244_s11 + $0x58] sm:$0xff]  ;;  %v344_v16 = vld [vmem:[%s1244_s11 + $0x68] sm:$0xff]  ;;  %v343_v17 = vld [vmem:[%s1244_s11 + $0x60] sm:$0xff] }
  0x13   : > { %v345_v18 = vld [vmem:[%s1244_s11 + $0x70] sm:$0xff]  ;;  %v346_v19 = vld [vmem:[%s1244_s11 + $0x78] sm:$0xff]  ;;  %v562_v21 = vld [vmem:[%s1255_s14 + $0x8] sm:$0xff] }
  0x14   : > { %v563_v23 = vld [vmem:[%s1255_s14 + $0x10] sm:$0xff]  ;;  %v564_v25 = vld [vmem:[%s1255_s14 + $0x18] sm:$0xff]  ;;  %v565_v29 = vld [vmem:[%s1255_s14 + $0x20] sm:$0xff] }
  0x15   : > { %v566_v36 = vld [vmem:[%s1255_s14 + $0x28] sm:$0xff]  ;;  %v567_v42 = vld [vmem:[%s1255_s14 + $0x30] sm:$0xff]  ;;  %v568_v47 = vld [vmem:[%s1255_s14 + $0x38] sm:$0xff] }
  0x16   : > { %v569_v53 = vld [vmem:[%s1255_s14 + $0x40] sm:$0xff]  ;;  %v570_v59 = vld [vmem:[%s1255_s14 + $0x48] sm:$0xff]  ;;  %v571_v63 = vld [vmem:[%s1255_s14 + $0x50] sm:$0xff] }
  0x17   : > { %359 = vperm.xlu1 %1171, %v334_v4   ;;  %353 = vperm.xlu0 %1170, %v332_v5   ;;  %v572_v1 = vld [vmem:[%s1255_s14 + $0x58] sm:$0xff]  ;;  %v573_v3 = vld [vmem:[%s1255_s14 + $0x60] sm:$0xff]  ;;  %v574_v4 = vld [vmem:[%s1255_s14 + $0x68] sm:$0xff] }
  0x18   : > { %365 = vperm.xlu2 %1172, %v336_v6   ;;  %v575_v5 = vld [vmem:[%s1255_s14 + $0x70] sm:$0xff]  ;;  %v576_v6 = vld [vmem:[%s1255_s14 + $0x78] sm:$0xff]  ;;  %v1375_v9 = vld [vmem:[%s1514_s4] ss:$0 sm:$0xff] }
  0x19   : > { %1111 = vmatmul.msk.f32.gmra.mxu1 %vm582_vm0, %v562_v21  ;;  %v715_v8 = vld [vmem:[%s1515_s5 + $0x18] sm:$0xff] }
  0x1a   : > { %894 = vmatpush.msra.mxu3 %v715_v8 }
  0x1f   : > { %371 = vperm.xlu1 %1171, %v338_v10   ;;  %368 = vperm.xlu0 %1170, %v337_v11   ;;  %v718_v11 = vld [vmem:[%s1516_s6 + $0x10] sm:$0xff] }
  0x20   : > { %374 = vperm.xlu2 %1172, %v339_v12   ;;  %v714_v12 = vld [vmem:[%s1515_s5 + $0x10] sm:$0xff]  ;;  %782 = vmatpush.msra.mxu2 %v718_v11 }
  0x21   : > { %1112 = vmatmul.msk.f32.gmra.mxu1 %vm582_vm0, %v563_v23  ;;  %895 = vmatpush.msra.mxu3 %v714_v12 }
  0x27   : > { %380 = vperm.xlu1 %1171, %v341_v13   ;;  %377 = vperm.xlu0 %1170, %v340_v14   ;;  %v717_v13 = vld [vmem:[%s1516_s6 + $0x8] sm:$0xff] }
  0x28   : > { %383 = vperm.xlu2 %1172, %v342_v15   ;;  %v713_v14 = vld [vmem:[%s1515_s5 + $0x8] sm:$0xff]  ;;  %783 = vmatpush.msra.mxu2 %v717_v13 }
  0x29   : > { %1113 = vmatmul.msk.f32.gmra.mxu1 %vm582_vm0, %v564_v25  ;;  %896 = vmatpush.msra.mxu3 %v713_v14 }
  0x2f   : > { %389 = vperm.xlu1 %1171, %v344_v16   ;;  %386 = vperm.xlu0 %1170, %v343_v17   ;;  %v716_v17 = vld [vmem:[%s1516_s6] sm:$0xff] }
  0x30   : > { %392 = vperm.xlu2 %1172, %v345_v18   ;;  %v712_v18 = vld [vmem:[%s1515_s5] sm:$0xff]  ;;  %784 = vmatpush.msra.mxu2 %v716_v17 }
  0x31   : > { %1114 = vmatmul.msk.f32.gmra.mxu1 %vm582_vm0, %v565_v29  ;;  %897 = vmatpush.msra.mxu3 %v712_v18 }
  0x37   : > { %395 = vperm.xlu0 %1170, %v346_v19  }
  0x39   : > { %1115 = vmatmul.msk.f32.gmra.mxu1 %vm582_vm0, %v566_v36 }
  0x41   : > { %1116 = vmatmul.msk.f32.gmra.mxu1 %vm582_vm0, %v567_v42 }
  0x49   : > { %1117 = vmatmul.msk.f32.gmra.mxu1 %vm582_vm0, %v568_v47 }
  0x51   : > { %1118 = vmatmul.msk.f32.gmra.mxu1 %vm582_vm0, %v569_v53 }
  0x59   : > { %1119 = vmatmul.msk.f32.gmra.mxu1 %vm582_vm0, %v570_v59 }
  0x61   : > { %1120 = vmatmul.msk.f32.gmra.mxu1 %vm582_vm0, %v571_v63 }
  0x69   : > { %1121 = vmatmul.msk.f32.gmra.mxu1 %vm582_vm0, %v572_v1 }
  0x6a   : > { %v363_v22 = vpop.permute.xlu2 %362 }
  0x6b   : > { %vm401_vm11 = vcmp.eq.s32.totalorder %v1287_v27, %v363_v22 }
  0x6c   : > { %v1082_v54 = vsel %vm401_vm11, 1.0, %v1184_v30 }
  0x71   : > { %1122 = vmatmul.msk.f32.gmra.mxu1 %vm582_vm0, %v573_v3 }
  0x72   : > { %v1283_v24 = vpop.permute.xlu2 %365 }
  0x73   : > { %vm402_vm14 = vcmp.eq.s32.totalorder %v1287_v27, %v1283_v24 }
  0x74   : > { %v1083_v61 = vsel %vm402_vm14, 1.0, %v1184_v30 }
  0x79   : > { %1123 = vmatmul.msk.f32.gmra.mxu1 %vm582_vm0, %v574_v4 }
  0x7a   : > { %v375_v28 = vpop.permute.xlu2 %374 }
  0x7b   : > { %vm405_vm1 = vcmp.eq.s32.totalorder %v1287_v27, %v375_v28 }
  0x7c   : > { %v1292_v31 = vsel %vm405_vm1, 1.0, %v1184_v30 }
  0x81   : > { %v357_v32 = vpop.permute.xlu1 %356  ;;  %v351_v33 = vpop.permute.xlu0 %350  ;;  %1124 = vmatmul.msk.f32.gmra.mxu1 %vm582_vm0, %v575_v5 }
  0x82   : > { %vm397_vm3 = vcmp.eq.s32.totalorder %v1287_v27, %v351_v33  ;;  %v384_v35 = vpop.permute.xlu2 %383  ;;  %vm399_vm7 = vcmp.eq.s32.totalorder %v1287_v27, %v357_v32 }
  0x83   : > { %v1078_v34 = vsel %vm397_vm3, 1.0, %v1184_v30  ;;  %vm408_vm4 = vcmp.eq.s32.totalorder %v1287_v27, %v384_v35  ;;  %v1080_v44 = vsel %vm399_vm7, 1.0, %v1184_v30 }
  0x84   : > { %1094 = vmatmul.msk.f32.vlgmr.msra.gmra.mxu0 %vm447_vm2, %v1078_v34  ;;  %v1301_v37 = vsel %vm408_vm4, 1.0, %v1184_v30 }
  0x89   : > { %v360_v38 = vpop.permute.xlu1 %359  ;;  %v354_v39 = vpop.permute.xlu0 %353  ;;  %1125 = vmatmul.msk.f32.gmra.mxu1 %vm582_vm0, %v576_v6  ;;  %vm720_vm0 = vcmask 261120  }
  0x8a   : > { %vm398_vm5 = vcmp.eq.s32.totalorder %v1287_v27, %v354_v39  ;;  %v393_v41 = vpop.permute.xlu2 %392  ;;  %vm400_vm8 = vcmp.eq.s32.totalorder %v1287_v27, %v360_v38 }
  0x8b   : > { %v1079_v40 = vsel %vm398_vm5, 1.0, %v1184_v30  ;;  %vm411_vm6 = vcmp.eq.s32.totalorder %v1287_v27, %v393_v41  ;;  %v1081_v50 = vsel %vm400_vm8, 1.0, %v1184_v30 }
  0x8c   : > { %1095 = vmatmul.msk.f32.gmra.mxu0 %vm447_vm2, %v1079_v40  ;;  %v1310_v43 = vsel %vm411_vm6, 1.0, %v1184_v30 }
  0x8e   : > { %v648_v10 = vpop.f32.mrf.mxu1 }
  0x8f   : > { %v649_v15 = vadd.f32 %v1375_v9, %v648_v10 }
  0x91   : > { %v372_v45 = vpop.permute.xlu1 %371  ;;  %v369_v46 = vpop.permute.xlu0 %368  ;;  %v696_v16 = vmax.f32 %v649_v15, 0.0 }
  0x92   : > { %vm403_vm1 = vcmp.eq.s32.totalorder %v1287_v27, %v369_v46  ;;  %vm404_vm3 = vcmp.eq.s32.totalorder %v1287_v27, %v372_v45 }
  0x93   : > { %v1084_v0 = vsel %vm403_vm1, 1.0, %v1184_v30  ;;  %v1085_v2 = vsel %vm404_vm3, 1.0, %v1184_v30  ;;  %1142 = vmatmul.msk.f32.vlgmr.msra.gmra.mxu3 %vm720_vm0, %v696_v16 }
  0x94   : > { %1096 = vmatmul.msk.f32.gmra.mxu0 %vm447_vm2, %v1080_v44 }
  0x96   : > { %v651_v19 = vpop.f32.mrf.mxu1 }
  0x97   : > { %v652_v20 = vadd.f32 %v1375_v9, %v651_v19 }
  0x99   : > { %v381_v48 = vpop.permute.xlu1 %380  ;;  %v378_v49 = vpop.permute.xlu0 %377  ;;  %v697_v21 = vmax.f32 %v652_v20, 0.0  ;;  %v1451_v20 = vld [vmem:[%s1517_s7] ss:$0 sm:$0xff] }
  0x9a   : > { %vm407_vm9 = vcmp.eq.s32.totalorder %v1287_v27, %v381_v48  ;;  %vm406_vm10 = vcmp.eq.s32.totalorder %v1287_v27, %v378_v49 }
  0x9b   : > { %v1088_v51 = vsel %vm407_vm9, 1.0, %v1184_v30  ;;  %v1087_v52 = vsel %vm406_vm10, 1.0, %v1184_v30  ;;  %1143 = vmatmul.msk.f32.gmra.mxu3 %vm720_vm0, %v697_v21 }
  0x9c   : > { %1097 = vmatmul.msk.f32.gmra.mxu0 %vm447_vm2, %v1081_v50 }
  0x9e   : > { %v654_v22 = vpop.f32.mrf.mxu1 }
  0x9f   : > { %v655_v23 = vadd.f32 %v1375_v9, %v654_v22 }
  0xa1   : > { %v390_v55 = vpop.permute.xlu1 %389  ;;  %v387_v56 = vpop.permute.xlu0 %386  ;;  %v698_v24 = vmax.f32 %v655_v23, 0.0 }
  0xa2   : > { %vm410_vm12 = vcmp.eq.s32.totalorder %v1287_v27, %v390_v55  ;;  %vm409_vm13 = vcmp.eq.s32.totalorder %v1287_v27, %v387_v56 }
  0xa3   : > { %v1091_v57 = vsel %vm410_vm12, 1.0, %v1184_v30  ;;  %v1090_v58 = vsel %vm409_vm13, 1.0, %v1184_v30  ;;  %1144 = vmatmul.msk.f32.gmra.mxu3 %vm720_vm0, %v698_v24 }
  0xa4   : > { %1098 = vmatmul.msk.f32.gmra.mxu0 %vm447_vm2, %v1082_v54 }
  0xa6   : > { %v657_v25 = vpop.f32.mrf.mxu1 }
  0xa7   : > { %v658_v26 = vadd.f32 %v1375_v9, %v657_v25 }
  0xa9   : > { %v396_v60 = vpop.permute.xlu0 %395 }
  0xaa   : > { %vm412_vm15 = vcmp.eq.s32.totalorder %v1287_v27, %v396_v60  ;;  %v699_v27 = vmax.f32 %v658_v26, 0.0 }
  0xab   : > { %v1093_v62 = vsel %vm412_vm15, 1.0, %v1184_v30 }
  0xac   : > { %1099 = vmatmul.msk.f32.gmra.mxu0 %vm447_vm2, %v1083_v61  ;;  %1145 = vmatmul.msk.f32.gmra.mxu3 %vm720_vm0, %v699_v27 }
  0xae   : > { %v660_v28 = vpop.f32.mrf.mxu1 }
  0xaf   : > { %v661_v29 = vadd.f32 %v1375_v9, %v660_v28 }
  0xb1   : > { %v700_v30 = vmax.f32 %v661_v29, 0.0 }
  0xb4   : > { %1100 = vmatmul.msk.f32.gmra.mxu0 %vm447_vm2, %v1084_v0  ;;  %1146 = vmatmul.msk.f32.gmra.mxu3 %vm720_vm0, %v700_v30 }
  0xb6   : > { %v663_v32 = vpop.f32.mrf.mxu1 }
  0xb7   : > { %v664_v33 = vadd.f32 %v1375_v9, %v663_v32 }
  0xb9   : > { %v701_v34 = vmax.f32 %v664_v33, 0.0 }
  0xbc   : > { %1101 = vmatmul.msk.f32.gmra.mxu0 %vm447_vm2, %v1085_v2  ;;  %1147 = vmatmul.msk.f32.gmra.mxu3 %vm720_vm0, %v701_v34 }
  0xbe   : > { %v666_v36 = vpop.f32.mrf.mxu1 }
  0xc4   : > { %1102 = vmatmul.msk.f32.gmra.mxu0 %vm447_vm2, %v1292_v31 }
  0xc6   : > { %v669_v40 = vpop.f32.mrf.mxu1 }
  0xc7   : > { %v670_v41 = vadd.f32 %v1375_v9, %v669_v40 }
  0xc9   : > { %v703_v42 = vmax.f32 %v670_v41, 0.0 }
  0xcc   : > { %1103 = vmatmul.msk.f32.gmra.mxu0 %vm447_vm2, %v1087_v52 }
  0xce   : > { %v672_v44 = vpop.f32.mrf.mxu1 }
  0xcf   : > { %v673_v45 = vadd.f32 %v1375_v9, %v672_v44 }
  0xd1   : > { %v704_v46 = vmax.f32 %v673_v45, 0.0 }
  0xd4   : > { %1104 = vmatmul.msk.f32.gmra.mxu0 %vm447_vm2, %v1088_v51 }
  0xd6   : > { %v675_v48 = vpop.f32.mrf.mxu1 }
  0xd7   : > { %v676_v49 = vadd.f32 %v1375_v9, %v675_v48 }
  0xd9   : > { %v705_v50 = vmax.f32 %v676_v49, 0.0 }
  0xdc   : > { %1105 = vmatmul.msk.f32.gmra.mxu0 %vm447_vm2, %v1301_v37  ;;  %v667_v37 = vadd.f32 %v1375_v9, %v666_v36 }
  0xde   : > { %v702_v38 = vmax.f32 %v667_v37, 0.0  ;;  %v678_v52 = vpop.f32.mrf.mxu1 }
  0xdf   : > { %v679_v53 = vadd.f32 %v1375_v9, %v678_v52 }
  0xe0   : > { %1148 = vmatmul.msk.f32.gmra.mxu3 %vm720_vm0, %v702_v38 }
  0xe1   : > { %v706_v54 = vmax.f32 %v679_v53, 0.0 }
  0xe4   : > { %1106 = vmatmul.msk.f32.gmra.mxu0 %vm447_vm2, %v1090_v58 }
  0xe6   : > { %v681_v56 = vpop.f32.mrf.mxu1 }
  0xe8   : > { %1149 = vmatmul.msk.f32.gmra.mxu3 %vm720_vm0, %v703_v42 }
  0xec   : > { %1107 = vmatmul.msk.f32.gmra.mxu0 %vm447_vm2, %v1091_v57  ;;  %v682_v57 = vadd.f32 %v1375_v9, %v681_v56 }
  0xee   : > { %v707_v58 = vmax.f32 %v682_v57, 0.0  ;;  %v684_v60 = vpop.f32.mrf.mxu1 }
  0xef   : > { %v685_v61 = vadd.f32 %v1375_v9, %v684_v60 }
  0xf0   : > { %1150 = vmatmul.msk.f32.gmra.mxu3 %vm720_vm0, %v704_v46 }
  0xf4   : > { %1108 = vmatmul.msk.f32.gmra.mxu0 %vm447_vm2, %v1310_v43 }
  0xf6   : > { %v687_v0 = vpop.f32.mrf.mxu1 }
  0xf7   : > { %v688_v1 = vadd.f32 %v1375_v9, %v687_v0 }
  0xf8   : > { %1151 = vmatmul.msk.f32.gmra.mxu3 %vm720_vm0, %v705_v50 }
  0xf9   : > { %v709_v2 = vmax.f32 %v688_v1, 0.0 }
  0xfc   : > { %1109 = vmatmul.msk.f32.gmra.mxu0 %vm447_vm2, %v1093_v62  ;;  %v708_v62 = vmax.f32 %v685_v61, 0.0 }
  0xfe   : > { %v690_v4 = vpop.f32.mrf.mxu1 }
  0xff   : > { %v691_v5 = vadd.f32 %v1375_v9, %v690_v4 }
 0x100   : > { %1152 = vmatmul.msk.f32.gmra.mxu3 %vm720_vm0, %v706_v54 }
 0x101   : > { %v513_v31 = vpop.f32.mrf.mxu0  ;;  %v710_v6 = vmax.f32 %v691_v5, 0.0 }
 0x102   : > { %1126 = vmatmul.msk.f32.vlgmr.msra.gmra.mxu2 %vm720_vm0, %v513_v31 }
 0x106   : > { %v693_v8 = vpop.f32.mrf.mxu1 }
 0x107   : > { %v694_v10 = vadd.f32 %v1375_v9, %v693_v8 }
 0x108   : > { %1153 = vmatmul.msk.f32.gmra.mxu3 %vm720_vm0, %v707_v58 }
 0x109   : > { %v516_v35 = vpop.f32.mrf.mxu0  ;;  %v711_v11 = vmax.f32 %v694_v10, 0.0 }
 0x10a   : > { %1127 = vmatmul.msk.f32.gmra.mxu2 %vm720_vm0, %v516_v35 }
 0x110   : > { %1154 = vmatmul.msk.f32.gmra.mxu3 %vm720_vm0, %v708_v62 }
 0x111   : > { %v519_v39 = vpop.f32.mrf.mxu0 }
 0x112   : > { %1128 = vmatmul.msk.f32.gmra.mxu2 %vm720_vm0, %v519_v39 }
 0x116   : > { %v899_v14 = vpop.f32.mrf.mxu3 }
 0x118   : > { %1155 = vmatmul.msk.f32.gmra.mxu3 %vm720_vm0, %v709_v2 }
 0x119   : > { %v522_v43 = vpop.f32.mrf.mxu0 }
 0x11a   : > { %1129 = vmatmul.msk.f32.gmra.mxu2 %vm720_vm0, %v522_v43 }
 0x11e   : > { %v902_v16 = vpop.f32.mrf.mxu3 }
 0x120   : > { %1156 = vmatmul.msk.f32.gmra.mxu3 %vm720_vm0, %v710_v6 }
 0x121   : > { %v525_v47 = vpop.f32.mrf.mxu0 }
 0x122   : > { %1130 = vmatmul.msk.f32.gmra.mxu2 %vm720_vm0, %v525_v47 }
 0x126   : > { %v905_v9 = vpop.f32.mrf.mxu3 }
 0x128   : > { %1157 = vmatmul.msk.f32.gmra.mxu3 %vm720_vm0, %v711_v11 }
 0x129   : > { %v528_v51 = vpop.f32.mrf.mxu0 }
 0x12a   : > { %1131 = vmatmul.msk.f32.gmra.mxu2 %vm720_vm0, %v528_v51 }
 0x12f   : > { %v908_v19 = vpop.f32.mrf.mxu3 }
 0x131   : > { %v531_v55 = vpop.f32.mrf.mxu0 }
 0x132   : > { %1132 = vmatmul.msk.f32.gmra.mxu2 %vm720_vm0, %v531_v55 }
 0x137   : > { %v911_v26 = vpop.f32.mrf.mxu3 }
 0x139   : > { %v534_v59 = vpop.f32.mrf.mxu0 }
 0x13a   : > { %1133 = vmatmul.msk.f32.gmra.mxu2 %vm720_vm0, %v534_v59 }
 0x13f   : > { %v914_v32 = vpop.f32.mrf.mxu3 }
 0x141   : > { %v537_v63 = vpop.f32.mrf.mxu0 }
 0x142   : > { %1134 = vmatmul.msk.f32.gmra.mxu2 %vm720_vm0, %v537_v63 }
 0x149   : > { %v540_v3 = vpop.f32.mrf.mxu0 }
 0x14a   : > { %1135 = vmatmul.msk.f32.gmra.mxu2 %vm720_vm0, %v540_v3 }
 0x151   : > { %v543_v7 = vpop.f32.mrf.mxu0 }
 0x152   : > { %1136 = vmatmul.msk.f32.gmra.mxu2 %vm720_vm0, %v543_v7 }
 0x159   : > { %v546_v12 = vpop.f32.mrf.mxu0 }
 0x15a   : > { %1137 = vmatmul.msk.f32.gmra.mxu2 %vm720_vm0, %v546_v12 }
 0x161   : > { %v549_v13 = vpop.f32.mrf.mxu0 }
 0x162   : > { %1138 = vmatmul.msk.f32.gmra.mxu2 %vm720_vm0, %v549_v13 }
 0x163   : > { %v917_v38 = vpop.f32.mrf.mxu3 }
 0x169   : > { %v552_v15 = vpop.f32.mrf.mxu0 }
 0x16a   : > { %1139 = vmatmul.msk.f32.gmra.mxu2 %vm720_vm0, %v552_v15 }
 0x16b   : > { %v920_v44 = vpop.f32.mrf.mxu3 }
 0x171   : > { %v555_v17 = vpop.f32.mrf.mxu0 }
 0x172   : > { %1140 = vmatmul.msk.f32.gmra.mxu2 %vm720_vm0, %v555_v17 }
 0x173   : > { %v923_v50 = vpop.f32.mrf.mxu3 }
 0x179   : > { %v558_v18 = vpop.f32.mrf.mxu0 }
 0x17a   : > { %1141 = vmatmul.msk.f32.gmra.mxu2 %vm720_vm0, %v558_v18 }
 0x17b   : > { %v926_v56 = vpop.f32.mrf.mxu3 }
 0x183   : > { %v929_v62 = vpop.f32.mrf.mxu3 }
 0x185   : > { %v786_v21 = vpop.f32.mrf.mxu2 }
 0x186   : > { %v900_v22 = vadd.f32 %v899_v14, %v786_v21 }
 0x188   : > { %v951_v23 = vadd.f32 %v1451_v20, %v900_v22 }
 0x18a   : > { %v967_v24 = vmax.f32 %v951_v23, 0.0 }
 0x18b   : > { %v932_v4 = vpop.f32.mrf.mxu3 }
 0x18c   : > { %983 = vst.msk [vmem:[%s1458_s23] sm:$0xff] %vm720_vm0, %v967_v24 }
 0x18d   : > { %v789_v25 = vpop.f32.mrf.mxu2 }
 0x18e   : > { %v903_v27 = vadd.f32 %v902_v16, %v789_v25 }
 0x190   : > { %v952_v28 = vadd.f32 %v1451_v20, %v903_v27 }
 0x192   : > { %v968_v29 = vmax.f32 %v952_v28, 0.0 }
 0x193   : > { %v935_v11 = vpop.f32.mrf.mxu3 }
 0x194   : > { %984 = vst.msk [vmem:[%s1458_s23 + $0x8] sm:$0xff] %vm720_vm0, %v968_v29 }
 0x195   : > { %v792_v30 = vpop.f32.mrf.mxu2 }
 0x196   : > { %v906_v31 = vadd.f32 %v905_v9, %v792_v30 }
 0x198   : > { %v953_v33 = vadd.f32 %v1451_v20, %v906_v31 }
 0x19a   : > { %v969_v34 = vmax.f32 %v953_v33, 0.0 }
 0x19b   : > { %v938_v17 = vpop.f32.mrf.mxu3 }
 0x19c   : > { %985 = vst.msk [vmem:[%s1458_s23 + $0x10] sm:$0xff] %vm720_vm0, %v969_v34 }
 0x19d   : > { %v795_v35 = vpop.f32.mrf.mxu2 }
 0x19e   : > { %v909_v36 = vadd.f32 %v908_v19, %v795_v35 }
 0x1a0   : > { %v954_v37 = vadd.f32 %v1451_v20, %v909_v36 }
 0x1a2   : > { %v970_v39 = vmax.f32 %v954_v37, 0.0 }
 0x1a3   : > { %v941_v23 = vpop.f32.mrf.mxu3 }
 0x1a4   : > { %986 = vst.msk [vmem:[%s1458_s23 + $0x18] sm:$0xff] %vm720_vm0, %v970_v39 }
 0x1a5   : > { %v798_v40 = vpop.f32.mrf.mxu2 }
 0x1a6   : > { %v912_v41 = vadd.f32 %v911_v26, %v798_v40 }
 0x1a8   : > { %v955_v42 = vadd.f32 %v1451_v20, %v912_v41 }
 0x1aa   : > { %v971_v43 = vmax.f32 %v955_v42, 0.0 }
 0x1ab   : > { %v944_v29 = vpop.f32.mrf.mxu3 }
 0x1ac   : > { %987 = vst.msk [vmem:[%s1458_s23 + $0x20] sm:$0xff] %vm720_vm0, %v971_v43 }
 0x1ad   : > { %v801_v45 = vpop.f32.mrf.mxu2 }
 0x1ae   : > { %v915_v46 = vadd.f32 %v914_v32, %v801_v45 }
 0x1b0   : > { %v956_v47 = vadd.f32 %v1451_v20, %v915_v46 }
 0x1b2   : > { %v972_v48 = vmax.f32 %v956_v47, 0.0 }
 0x1b4   : > { %988 = vst.msk [vmem:[%s1458_s23 + $0x28] sm:$0xff] %vm720_vm0, %v972_v48 }
 0x1b5   : > { %v804_v49 = vpop.f32.mrf.mxu2 }
 0x1b6   : > { %v918_v51 = vadd.f32 %v917_v38, %v804_v49 }
 0x1b8   : > { %v957_v52 = vadd.f32 %v1451_v20, %v918_v51 }
 0x1ba   : > { %v973_v53 = vmax.f32 %v957_v52, 0.0 }
 0x1bc   : > { %989 = vst.msk [vmem:[%s1458_s23 + $0x30] sm:$0xff] %vm720_vm0, %v973_v53 }
 0x1bd   : > { %v807_v54 = vpop.f32.mrf.mxu2 }
 0x1be   : > { %v921_v55 = vadd.f32 %v920_v44, %v807_v54 }
 0x1c0   : > { %v958_v57 = vadd.f32 %v1451_v20, %v921_v55 }
 0x1c2   : > { %v974_v58 = vmax.f32 %v958_v57, 0.0 }
 0x1c4   : > { %990 = vst.msk [vmem:[%s1458_s23 + $0x38] sm:$0xff] %vm720_vm0, %v974_v58 }
 0x1c5   : > { %v810_v59 = vpop.f32.mrf.mxu2 }
 0x1c6   : > { %v924_v60 = vadd.f32 %v923_v50, %v810_v59 }
 0x1c8   : > { %v959_v61 = vadd.f32 %v1451_v20, %v924_v60 }
 0x1ca   : > { %v975_v63 = vmax.f32 %v959_v61, 0.0 }
 0x1cc   : > { %991 = vst.msk [vmem:[%s1458_s23 + $0x40] sm:$0xff] %vm720_vm0, %v975_v63 }
 0x1cd   : > { %v813_v0 = vpop.f32.mrf.mxu2 }
 0x1ce   : > { %v927_v1 = vadd.f32 %v926_v56, %v813_v0 }
 0x1d0   : > { %v960_v2 = vadd.f32 %v1451_v20, %v927_v1 }
 0x1d2   : > { %v976_v3 = vmax.f32 %v960_v2, 0.0 }
 0x1d4   : > { %992 = vst.msk [vmem:[%s1458_s23 + $0x48] sm:$0xff] %vm720_vm0, %v976_v3 }
 0x1d5   : > { %v816_v5 = vpop.f32.mrf.mxu2 }
 0x1d6   : > { %v930_v6 = vadd.f32 %v929_v62, %v816_v5 }
 0x1d8   : > { %v961_v7 = vadd.f32 %v1451_v20, %v930_v6 }
 0x1da   : > { %v977_v8 = vmax.f32 %v961_v7, 0.0 }
 0x1dc   : > { %993 = vst.msk [vmem:[%s1458_s23 + $0x50] sm:$0xff] %vm720_vm0, %v977_v8 }
 0x1dd   : > { %v819_v10 = vpop.f32.mrf.mxu2 }
 0x1de   : > { %v933_v12 = vadd.f32 %v932_v4, %v819_v10 }
 0x1e0   : > { %v962_v13 = vadd.f32 %v1451_v20, %v933_v12 }
 0x1e2   : > { %v978_v14 = vmax.f32 %v962_v13, 0.0 }
 0x1e4   : > { %994 = vst.msk [vmem:[%s1458_s23 + $0x58] sm:$0xff] %vm720_vm0, %v978_v14 }
 0x1e5   : > { %v822_v15 = vpop.f32.mrf.mxu2 }
 0x1e6   : > { %v936_v16 = vadd.f32 %v935_v11, %v822_v15 }
 0x1e8   : > { %v963_v18 = vadd.f32 %v1451_v20, %v936_v16 }
 0x1ea   : > { %v979_v9 = vmax.f32 %v963_v18, 0.0 }
 0x1ec   : > { %995 = vst.msk [vmem:[%s1458_s23 + $0x60] sm:$0xff] %vm720_vm0, %v979_v9 }
 0x1ed   : > { %v825_v19 = vpop.f32.mrf.mxu2 }
 0x1ee   : > { %v939_v21 = vadd.f32 %v938_v17, %v825_v19 }
 0x1f0   : > { %v964_v22 = vadd.f32 %v1451_v20, %v939_v21 }
 0x1f2   : > { %v980_v24 = vmax.f32 %v964_v22, 0.0 }
 0x1f4   : > { %996 = vst.msk [vmem:[%s1458_s23 + $0x68] sm:$0xff] %vm720_vm0, %v980_v24 }
 0x1f5   : > { %v828_v25 = vpop.f32.mrf.mxu2 }
 0x1f6   : > { %v942_v26 = vadd.f32 %v941_v23, %v828_v25 }
 0x1f8   : > { %v965_v27 = vadd.f32 %v1451_v20, %v942_v26 }
 0x1fa   : > { %v981_v28 = vmax.f32 %v965_v27, 0.0 }
 0x1fc   : > { %997 = vst.msk [vmem:[%s1458_s23 + $0x70] sm:$0xff] %vm720_vm0, %v981_v28 }
 0x1fd   : > { %v831_v30 = vpop.f32.mrf.mxu2 }
 0x1fe   : > { %v945_v31 = vadd.f32 %v944_v29, %v831_v30 }
 0x200   : > { %v966_v32 = vadd.f32 %v1451_v20, %v945_v31 }
 0x202   : > { %v982_v33 = vmax.f32 %v966_v32, 0.0 }
 0x204   : > { %998 = vst.msk [vmem:[%s1458_s23 + $0x78] sm:$0xff] %vm720_vm0, %v982_v33 }
 0x205 PF: > { %s18_s27 = sadd.s32 1, %s1181_s27  }
 0x206   : > { %p15_p4 = scmp.ge.s32.totalorder %s18_s27, 4  }
 0x208   :  { %17 = sbr.rel (!%p15_p4) target bundleno = 1 (0x1), region = 85 }

</bundles_post_ra>
